<compile_context>
chip_gen: v7x
topology: tpu7x:2x2x1
jax: 0.10.0
libtpu: 0.0.40
codegen_flags: <defaults>
</compile_context>

<pallas_src>
import functools

import jax
import jax.numpy as jnp
from jax.experimental import pallas as pl
from jax.experimental.pallas import tpu as pltpu


def _round_up(x, m):
    return (x + m - 1) // m * m


def _skip_lstm_cell_kernel(act_ref, w1_ref, ws_ref, out_ref, *, I, H):
    Hh = H // 2
    act = act_ref[...]                                  # (B, K_pad), lane-dense load

    h0 = act[:, I:I + H]
    c0 = act[:, I + H:I + 2 * H]
    cum = act[:, I + 2 * H:I + 2 * H + 1]

    # ---- fused LSTM cell: one (B, K_pad) @ (K_pad, 4H) MXU matmul (bias in ones row) ----
    gates = jnp.dot(act, w1_ref[...], preferred_element_type=jnp.float32)   # (B, 4H)
    sig = jax.nn.sigmoid(gates)                         # full-vreg EUP, sliced below
    tah = jnp.tanh(gates)
    i_g = sig[:, 0:H]
    f_g = sig[:, H:2 * H]
    g_g = tah[:, 2 * H:3 * H]
    o_g = sig[:, 3 * H:4 * H]
    c1 = f_g * c0 + i_g * g_g
    h1 = o_g * jnp.tanh(c1)

    # ---- fused skip-gate + threshold-gate MLPs (2 dots, broadcast bias adds) ----
    w2 = ws_ref[0:2 * H, 0:2 * Hh]                              # (2H, 2Hh)
    w3 = ws_ref[2 * H:2 * H + 2 * Hh, 0:2]                      # (2Hh, 2)
    b2 = ws_ref[2 * H + 2 * Hh:2 * H + 2 * Hh + 1, 0:2 * Hh]    # (1, 2Hh)
    b3 = ws_ref[2 * H + 2 * Hh + 1:2 * H + 2 * Hh + 2, 0:2]     # (1, 2)

    cc1 = jnp.concatenate([c0, c1], axis=-1)                    # (B, 2H)
    mid = jnp.dot(cc1, w2, preferred_element_type=jnp.float32) + b2
    mid = jnp.where(mid > 0, mid, 0.01 * mid)                   # LeakyReLU(0.01)
    probs = jax.nn.sigmoid(
        jnp.dot(mid, w3, preferred_element_type=jnp.float32) + b3)          # (B, 2)
    update_prob_delta = probs[:, 0:1]
    update_threshold = probs[:, 1:2]

    # ---- straight-through round gate (forward) + state blending ----
    update_prob = cum + jnp.minimum(update_prob_delta, 1.0 - cum)
    gate = (update_prob > update_threshold).astype(jnp.float32)

    new_h = gate * h1 + (1.0 - gate) * h0
    new_c = gate * c1 + (1.0 - gate) * c0
    update_cum = (1.0 - gate) * update_prob

    # ---- single lane-dense (B, 128) packed output, one unmasked store ----
    B = out_ref.shape[0]
    pad = out_ref.shape[1] - (2 * H + 3)
    out_ref[...] = jnp.concatenate(
        [new_h, new_c, update_cum, update_prob_delta, update_prob,
         jnp.zeros((B, pad), jnp.float32)], axis=-1)


def skip_torchlstm_cell_forward(x, hidden, packed):
    """x: (B, I); hidden = (h0, c0, cum) with h0/c0 (1, B, H), cum (B, 1)."""
    h0, c0, cum = hidden
    B, I = x.shape
    H = h0.shape[-1]
    K_pad = packed["w1"].shape[0]
    out_w = _round_up(2 * H + 3, 128)

    ones = jnp.ones((B, 1), jnp.float32)
    zpad = jnp.zeros((B, K_pad - (I + 2 * H + 2)), jnp.float32)
    act = jnp.concatenate([x, h0[0], c0[0], cum, ones, zpad], axis=-1)   # (B, K_pad)

    vmem = pl.BlockSpec(memory_space=pltpu.MemorySpace.VMEM)
    out = pl.pallas_call(
        functools.partial(_skip_lstm_cell_kernel, I=I, H=H),
        out_shape=jax.ShapeDtypeStruct((B, out_w), jnp.float32),
        in_specs=[vmem, vmem, vmem],
        out_specs=vmem,
    )(act, packed["w1"], packed["w_small"])

    new_h = out[:, 0:H]
    new_c = out[:, H:2 * H]
    update_cum = out[:, 2 * H:2 * H + 1]
    update_prob_delta = out[:, 2 * H + 1:2 * H + 2]
    update_prob = out[:, 2 * H + 2:2 * H + 3]
    # restore PyTorch's (num_layers, B, H) convention for h/c
    return (new_h[None], new_c[None], update_cum, update_prob_delta, update_prob)


def _init_params(key, input_size, hidden_size):
    """Unpacked parameters mirroring the PyTorch module (used by the reference)."""
    H, I, Hh = hidden_size, input_size, hidden_size // 2
    ks = list(jax.random.split(key, 16))
    u = lambda k, shape, bound: jax.random.uniform(k, shape, jnp.float32, -bound, bound)
    bl = 1.0 / jnp.sqrt(H)          # LSTM init bound (PyTorch default)
    bH = 1.0 / jnp.sqrt(H)          # Linear(H, H/2) bound
    bHh = 1.0 / jnp.sqrt(Hh)        # Linear(H/2, 1) bound
    # LSTM weights stored transposed: (in, 4H); gate order i,f,g,o
    return dict(
        w_ih_t=u(ks[0], (I, 4 * H), bl),
        w_hh_t=u(ks[1], (H, 4 * H), bl),
        b_gates=u(ks[2], (1, 4 * H), bl) + u(ks[3], (1, 4 * H), bl),  # b_ih + b_hh
        w_sp_t=u(ks[4], (H, Hh), bH), b_sp=u(ks[5], (1, Hh), bH),
        w_sc_t=u(ks[6], (H, Hh), bH), b_sc=u(ks[7], (1, Hh), bH),
        w_so_t=u(ks[8], (Hh, 1), bHh), b_so=u(ks[9], (1, 1), bHh),
        w_tp_t=u(ks[10], (H, Hh), bH), b_tp=u(ks[11], (1, Hh), bH),
        w_to_t=u(ks[12], (Hh, 1), bHh), b_to=u(ks[13], (1, 1), bHh),
    )


def _pack_params(p, input_size, hidden_size):
    """Host-side fusion of all 13 weight/bias tensors into 2 lane-dense slabs."""
    I, H = input_size, hidden_size
    Hh = H // 2
    f32 = jnp.float32
    K_pad = _round_up(I + 2 * H + 2, 128)

    # W1 rows follow act = [x | h0 | c0 | cum | 1 | pad]; c0/cum/pad rows are zero,
    # the ones row carries the combined LSTM bias (b_ih + b_hh).
    w1 = jnp.zeros((K_pad, 4 * H), f32)
    w1 = w1.at[0:I, :].set(p["w_ih_t"])
    w1 = w1.at[I:I + H, :].set(p["w_hh_t"])
    w1 = w1.at[I + 2 * H + 1, :].set(p["b_gates"][0])

    # Small-weight slab (single DMA): W2 | W3 | b2 | b3 packed row-wise, zero-padded.
    # W2 rows follow [c0 | c1]; cols = [skip-gate Hh | threshold-gate Hh].
    w2 = jnp.concatenate([
        jnp.concatenate([p["w_sp_t"], p["w_tp_t"]], axis=1),              # c0 rows
        jnp.concatenate([p["w_sc_t"], jnp.zeros((H, Hh), f32)], axis=1),  # c1 rows
    ], axis=0)                                                            # (2H, 2Hh)
    # W3 rows follow [skip_mid | thr_mid]; cols = [update_prob_delta | threshold].
    w3 = jnp.concatenate([
        jnp.concatenate([p["w_so_t"], jnp.zeros((Hh, 1), f32)], axis=1),
        jnp.concatenate([jnp.zeros((Hh, 1), f32), p["w_to_t"]], axis=1),
    ], axis=0)                                                            # (2Hh, 2)
    b2 = jnp.concatenate([p["b_sp"] + p["b_sc"], p["b_tp"]], axis=1)      # (1, 2Hh)
    b3 = jnp.concatenate([p["b_so"], p["b_to"]], axis=1)                  # (1, 2)

    ws_rows = _round_up(2 * H + 2 * Hh + 2, 8)
    ws_cols = _round_up(2 * Hh, 128)
    ws = jnp.zeros((ws_rows, ws_cols), f32)
    ws = ws.at[0:2 * H, 0:2 * Hh].set(w2)
    ws = ws.at[2 * H:2 * H + 2 * Hh, 0:2].set(w3)
    ws = ws.at[2 * H + 2 * Hh, 0:2 * Hh].set(b2[0])
    ws = ws.at[2 * H + 2 * Hh + 1, 0:2].set(b3[0])
    return dict(w1=w1, w_small=ws)


def _reference_forward(x, hidden, p):
    """Pure-JAX reference mirroring the PyTorch module, for verification."""
    h0, c0, cum = hidden
    H = h0.shape[-1]
    gates = x @ p["w_ih_t"] + h0[0] @ p["w_hh_t"] + p["b_gates"]
    i = jax.nn.sigmoid(gates[:, :H]); f = jax.nn.sigmoid(gates[:, H:2 * H])
    g = jnp.tanh(gates[:, 2 * H:3 * H]); o = jax.nn.sigmoid(gates[:, 3 * H:])
    c1 = f * c0[0] + i * g
    h1 = o * jnp.tanh(c1)
    lrelu = lambda v: jnp.where(v > 0, v, 0.01 * v)
    sg = lrelu(c0[0] @ p["w_sp_t"] + p["b_sp"] + c1 @ p["w_sc_t"] + p["b_sc"])
    upd = jax.nn.sigmoid(sg @ p["w_so_t"] + p["b_so"])
    tg = lrelu(c0[0] @ p["w_tp_t"] + p["b_tp"])
    thr = jax.nn.sigmoid(tg @ p["w_to_t"] + p["b_to"])
    up = cum + jnp.minimum(upd, 1.0 - cum)
    gate = (up > thr).astype(jnp.float32)
    outs = ((gate * h1 + (1 - gate) * h0[0])[None],
            (gate * c1 + (1 - gate) * c0[0])[None],
            (1 - gate) * up, upd, up)
    return outs, thr


if __name__ == "__main__":
    INPUT_SIZE, HIDDEN_SIZE, NUM_LAYERS, BATCH = 32, 32, 1, 8

    key = jax.random.PRNGKey(0)
    k_p, k_x, k_h, k_c, k_u = jax.random.split(key, 5)
    params = _init_params(k_p, INPUT_SIZE, HIDDEN_SIZE)
    packed = _pack_params(params, INPUT_SIZE, HIDDEN_SIZE)

    x = jax.random.normal(k_x, (BATCH, INPUT_SIZE), jnp.float32)
    h0 = jax.random.normal(k_h, (NUM_LAYERS, BATCH, HIDDEN_SIZE), jnp.float32)
    c0 = jax.random.normal(k_c, (NUM_LAYERS, BATCH, HIDDEN_SIZE), jnp.float32)
    cum = jax.random.uniform(k_u, (BATCH, 1), jnp.float32, 0.0, 0.5)

    out = skip_torchlstm_cell_forward(x, (h0, c0, cum), packed)
    out = jax.block_until_ready(out)

    ref, thr = _reference_forward(x, (h0, c0, cum), params)

    # Gate-aware verification: the discrete straight-through gate can flip for
    # samples whose update_prob sits within float noise of the threshold, so
    # gate-dependent outputs are compared only on decisively-gated rows.
    safe = (jnp.abs(ref[4] - thr) > 1e-3)[:, 0]
    assert bool(safe.any()), "no decisively-gated samples to compare"
    gate_dependent = (True, True, True, False, False)
    for a, b, dep in zip(out, ref, gate_dependent):
        assert a.shape == b.shape, f"shape mismatch {a.shape} vs {b.shape}"
        if dep:
            a = a[..., safe, :]
            b = b[..., safe, :]
        assert jnp.allclose(a, b, atol=1e-4, rtol=1e-4), "mismatch vs reference"

    print("KERNEL_OK")
</pallas_src>

<mosaic_0001>
module attributes {stable_mosaic.version = 11 : i64} {
  func.func @_skip_lstm_cell_kernel(%arg0: memref<8x128xf32, #tpu.memory_space<vmem>>, %arg1: memref<128x128xf32, #tpu.memory_space<vmem>>, %arg2: memref<104x128xf32, #tpu.memory_space<vmem>>, %arg3: memref<8x128xf32, #tpu.memory_space<vmem>>) attributes {dimension_semantics = [], scalar_prefetch = 0 : i64, scratch_operands = 0 : i64, tpu.core_type = #tpu.core_type<tc>} {
    %c0 = arith.constant 0 : index
    %c0_0 = arith.constant 0 : index
    %0 = vector.load %arg0[%c0, %c0_0] : memref<8x128xf32, #tpu.memory_space<vmem>>, vector<8x128xf32>
    %1 = vector.extract_strided_slice %0 {offsets = [0, 32], sizes = [8, 32], strides = [1, 1]} : vector<8x128xf32> to vector<8x32xf32>
    %2 = vector.extract_strided_slice %0 {offsets = [0, 64], sizes = [8, 32], strides = [1, 1]} : vector<8x128xf32> to vector<8x32xf32>
    %3 = vector.extract_strided_slice %0 {offsets = [0, 96], sizes = [8, 1], strides = [1, 1]} : vector<8x128xf32> to vector<8x1xf32>
    %c0_1 = arith.constant 0 : index
    %c0_2 = arith.constant 0 : index
    %4 = vector.load %arg1[%c0_1, %c0_2] : memref<128x128xf32, #tpu.memory_space<vmem>>, vector<128x128xf32>
    %cst = arith.constant dense<0.000000e+00> : vector<8x128xf32>
    %5 = tpu.matmul %0, %4, %cst {dimension_numbers = #tpu.dot_dimension_numbers<[1], [0], [0], [1], [0, 0, 1, 1], [], []>} : vector<8x128xf32>, vector<128x128xf32>, vector<8x128xf32> -> vector<8x128xf32>
    %6 = arith.negf %5 : vector<8x128xf32>
    %7 = math.exp %6 : vector<8x128xf32>
    %cst_3 = arith.constant 1.000000e+00 : f32
    %8 = vector.broadcast %cst_3 : f32 to vector<8x128xf32>
    %9 = arith.addf %8, %7 : vector<8x128xf32>
    %10 = arith.divf %8, %9 : vector<8x128xf32>
    %11 = math.tanh %5 : vector<8x128xf32>
    %12 = vector.extract_strided_slice %10 {offsets = [0, 0], sizes = [8, 32], strides = [1, 1]} : vector<8x128xf32> to vector<8x32xf32>
    %13 = vector.extract_strided_slice %10 {offsets = [0, 32], sizes = [8, 32], strides = [1, 1]} : vector<8x128xf32> to vector<8x32xf32>
    %14 = vector.extract_strided_slice %11 {offsets = [0, 64], sizes = [8, 32], strides = [1, 1]} : vector<8x128xf32> to vector<8x32xf32>
    %15 = vector.extract_strided_slice %10 {offsets = [0, 96], sizes = [8, 32], strides = [1, 1]} : vector<8x128xf32> to vector<8x32xf32>
    %16 = arith.mulf %13, %2 : vector<8x32xf32>
    %17 = arith.mulf %12, %14 : vector<8x32xf32>
    %18 = arith.addf %16, %17 : vector<8x32xf32>
    %19 = math.tanh %18 : vector<8x32xf32>
    %20 = arith.mulf %15, %19 : vector<8x32xf32>
    %c0_4 = arith.constant 0 : index
    %c0_5 = arith.constant 0 : index
    %21 = vector.load %arg2[%c0_4, %c0_5] : memref<104x128xf32, #tpu.memory_space<vmem>>, vector<64x32xf32>
    %c64 = arith.constant 64 : index
    %c0_6 = arith.constant 0 : index
    %22 = vector.load %arg2[%c64, %c0_6] : memref<104x128xf32, #tpu.memory_space<vmem>>, vector<32x2xf32>
    %c96 = arith.constant 96 : index
    %c0_7 = arith.constant 0 : index
    %23 = vector.load %arg2[%c96, %c0_7] : memref<104x128xf32, #tpu.memory_space<vmem>>, vector<1x32xf32>
    %c97 = arith.constant 97 : index
    %c0_8 = arith.constant 0 : index
    %24 = vector.load %arg2[%c97, %c0_8] : memref<104x128xf32, #tpu.memory_space<vmem>>, vector<1x2xf32>
    %25 = tpu.concatenate %2, %18 in 1 : vector<8x32xf32>, vector<8x32xf32> -> vector<8x64xf32>
    %cst_9 = arith.constant dense<0.000000e+00> : vector<8x32xf32>
    %26 = tpu.matmul %25, %21, %cst_9 {dimension_numbers = #tpu.dot_dimension_numbers<[1], [0], [0], [1], [0, 0, 1, 1], [], []>} : vector<8x64xf32>, vector<64x32xf32>, vector<8x32xf32> -> vector<8x32xf32>
    %27 = vector.broadcast %23 : vector<1x32xf32> to vector<8x32xf32>
    %28 = arith.addf %26, %27 : vector<8x32xf32>
    %cst_10 = arith.constant 0.000000e+00 : f32
    %29 = vector.broadcast %cst_10 : f32 to vector<8x32xf32>
    %30 = arith.cmpf ogt, %28, %29 : vector<8x32xf32>
    %cst_11 = arith.constant 0.00999999977 : f32
    %31 = vector.broadcast %cst_11 : f32 to vector<8x32xf32>
    %32 = arith.mulf %31, %28 : vector<8x32xf32>
    %33 = arith.select %30, %28, %32 : vector<8x32xi1>, vector<8x32xf32>
    %cst_12 = arith.constant dense<0.000000e+00> : vector<8x2xf32>
    %34 = tpu.matmul %33, %22, %cst_12 {dimension_numbers = #tpu.dot_dimension_numbers<[1], [0], [0], [1], [0, 0, 1, 1], [], []>} : vector<8x32xf32>, vector<32x2xf32>, vector<8x2xf32> -> vector<8x2xf32>
    %35 = vector.broadcast %24 : vector<1x2xf32> to vector<8x2xf32>
    %36 = arith.addf %34, %35 : vector<8x2xf32>
    %37 = arith.negf %36 : vector<8x2xf32>
    %38 = math.exp %37 : vector<8x2xf32>
    %cst_13 = arith.constant 1.000000e+00 : f32
    %39 = vector.broadcast %cst_13 : f32 to vector<8x2xf32>
    %40 = arith.addf %39, %38 : vector<8x2xf32>
    %41 = arith.divf %39, %40 : vector<8x2xf32>
    %42 = vector.extract_strided_slice %41 {offsets = [0, 0], sizes = [8, 1], strides = [1, 1]} : vector<8x2xf32> to vector<8x1xf32>
    %43 = vector.extract_strided_slice %41 {offsets = [0, 1], sizes = [8, 1], strides = [1, 1]} : vector<8x2xf32> to vector<8x1xf32>
    %cst_14 = arith.constant 1.000000e+00 : f32
    %44 = vector.broadcast %cst_14 : f32 to vector<8x1xf32>
    %45 = arith.subf %44, %3 : vector<8x1xf32>
    %46 = arith.minimumf %42, %45 : vector<8x1xf32>
    %47 = arith.addf %3, %46 : vector<8x1xf32>
    %48 = arith.cmpf ogt, %47, %43 : vector<8x1xf32>
    %49 = arith.extui %48 : vector<8x1xi1> to vector<8x1xi32>
    %50 = arith.sitofp %49 : vector<8x1xi32> to vector<8x1xf32>
    %51 = vector.broadcast %50 : vector<8x1xf32> to vector<8x32xf32>
    %52 = arith.mulf %51, %20 : vector<8x32xf32>
    %cst_15 = arith.constant 1.000000e+00 : f32
    %53 = vector.broadcast %cst_15 : f32 to vector<8x1xf32>
    %54 = arith.subf %53, %50 : vector<8x1xf32>
    %55 = vector.broadcast %54 : vector<8x1xf32> to vector<8x32xf32>
    %56 = arith.mulf %55, %1 : vector<8x32xf32>
    %57 = arith.addf %52, %56 : vector<8x32xf32>
    %58 = vector.broadcast %50 : vector<8x1xf32> to vector<8x32xf32>
    %59 = arith.mulf %58, %18 : vector<8x32xf32>
    %cst_16 = arith.constant 1.000000e+00 : f32
    %60 = vector.broadcast %cst_16 : f32 to vector<8x1xf32>
    %61 = arith.subf %60, %50 : vector<8x1xf32>
    %62 = vector.broadcast %61 : vector<8x1xf32> to vector<8x32xf32>
    %63 = arith.mulf %62, %2 : vector<8x32xf32>
    %64 = arith.addf %59, %63 : vector<8x32xf32>
    %cst_17 = arith.constant 1.000000e+00 : f32
    %65 = vector.broadcast %cst_17 : f32 to vector<8x1xf32>
    %66 = arith.subf %65, %50 : vector<8x1xf32>
    %67 = arith.mulf %66, %47 : vector<8x1xf32>
    %cst_18 = arith.constant 0.000000e+00 : f32
    %68 = vector.broadcast %cst_18 : f32 to vector<8x61xf32>
    %69 = tpu.concatenate %57, %64, %67, %42, %47, %68 in 1 : vector<8x32xf32>, vector<8x32xf32>, vector<8x1xf32>, vector<8x1xf32>, vector<8x1xf32>, vector<8x61xf32> -> vector<8x128xf32>
    %c0_19 = arith.constant 0 : index
    %c0_20 = arith.constant 0 : index
    %70 = vector.load %arg3[%c0_19, %c0_20] : memref<8x128xf32, #tpu.memory_space<vmem>>, vector<8x128xf32>
    tpu.vector_store %arg3[%c0_19, %c0_20], %69 {strides = array<i32>} : memref<8x128xf32, #tpu.memory_space<vmem>>, vector<8x128xf32>,
    return
  }
}

</mosaic_0001>

<bundles_post_ra>
// kernel: tpu_custom_call.1
= control target key start
LH: loop header
LB: loop body
LE: loop exit
PB: predicated region body
PF: predicated region fallthrough
CT: control target
= control target key end

     0   :  { %8 = vsyncpa [#allocation3], 0  ;;  %s848_s0 = inlined_call_operand.hbm [shape: f32[8,128], index: 0, kind: input, shape index: {}]   ;;  %s849_s1 = inlined_call_operand.hbm [shape: f32[128,128], index: 1, kind: input, shape index: {}]   ;;  %s850_s2 = inlined_call_operand.hbm [shape: f32[104,128], index: 2, kind: input, shape index: {}]   ;;  %s851_s3 = inlined_call_operand.hbm [shape: f32[8,128], index: 3, kind: output, shape index: {}]  }
   0x1   :  { %9 = vsyncpa [#allocation6], 0 }
   0x2   :  { %10 = vsyncpa [#allocation4], 0  ;;  %s703_s12 = smov [#allocation5]   ;;  %s609_s16 = scalar_lea.hbm %s849_s1, 2048 }
   0x3   :  { %s26_s13 = sshll.u32 %s703_s12, 4  ;;  %p610_p0 = scmp.ne.s32.totalorder %s849_s1, %s609_s16  ;;  %s27_s13 = int_to_ptr.vmem [resolvable:$true] %s26_s13 }
   0x4   :  { %p613_p1 = scmp.lt.u32.totalorder %s609_s16, %s849_s1 }
   0x6   :  { %p615_p2 = pnand %p613_p1, %p610_p0 }
   0x8   :  { %618 = shalt.err (!%p615_p2)
}
   0x9   :  { %s619_s21 = scalar_lea.vmem %s27_s13, 2048  ;;  %p624_p4 = scmp.lt.s32.totalorder %s27_s13, %s27_s13 }
   0xa   :  { %p620_p3 = scmp.ne.s32.totalorder %s27_s13, %s619_s21  ;;  %p625_p5 = scmp.lt.s32.totalorder %s619_s21, %s619_s21 }
   0xc   :  { %p626_p6 = por %p625_p5, %p624_p4 }
   0xe   :  { %p627_p7 = pnand %p626_p6, %p620_p3 }
  0x10   :  { %630 = shalt.err (!%p627_p7)
}
  0x11   :  { %s704_s22 = smov 128   ;;  %s705_s23 = smov 8  }
  0x12   :  { %32 = dma.hbm_to_vmem [thread:$0]  %s849_s1, 2048, %s27_s13, [#allocation6], %s704_s22, %s704_s22, %s705_s23  }
  0x13   :  { %s706_s26 = smov [#allocation2]   ;;  %s707_s28 = smov [#allocation7]  }
  0x14   :  { %s17_s27 = sshll.u32 %s706_s26, 4  ;;  %s38_s29 = sshll.u32 %s707_s28, 4  ;;  %s18_s27 = int_to_ptr.vmem [resolvable:$true] %s17_s27  ;;  %s39_s29 = int_to_ptr.vmem [resolvable:$true] %s38_s29 }
  0x15   :  { %s631_s5 = scalar_lea.hbm %s848_s0, 128 }
  0x16   :  { %p632_p8 = scmp.ne.s32.totalorder %s848_s0, %s631_s5  ;;  %p635_p9 = scmp.lt.u32.totalorder %s631_s5, %s848_s0 }
  0x18   :  { %p637_p10 = pnand %p635_p9, %p632_p8 }
  0x1a   :  { %640 = shalt.err (!%p637_p10)
}
  0x1b   :  { %s641_s1 = scalar_lea.vmem %s18_s27, 128  ;;  %p646_p12 = scmp.lt.s32.totalorder %s18_s27, %s18_s27 }
  0x1c   :  { %p642_p11 = scmp.ne.s32.totalorder %s18_s27, %s641_s1  ;;  %p647_p13 = scmp.lt.s32.totalorder %s641_s1, %s641_s1 }
  0x1e   :  { %p648_p0 = por %p647_p13, %p646_p12 }
  0x20   :  { %p649_p1 = pnand %p648_p0, %p642_p11 }
  0x22   :  { %652 = shalt.err (!%p649_p1)
}
  0x23   :  { %20 = dma.hbm_to_vmem [thread:$0]  %s848_s0, 128, %s18_s27, [#allocation3]  }
  0x24   :  { %s653_s14 = scalar_lea.hbm %s850_s2, 1664 }
  0x25   :  { %p654_p2 = scmp.ne.s32.totalorder %s850_s2, %s653_s14  ;;  %p657_p3 = scmp.lt.u32.totalorder %s653_s14, %s850_s2 }
  0x27   :  { %p659_p4 = pnand %p657_p3, %p654_p2 }
  0x29   :  { %662 = shalt.err (!%p659_p4)
}
  0x2a   :  { %s663_s19 = scalar_lea.vmem %s39_s29, 1664  ;;  %p668_p6 = scmp.lt.s32.totalorder %s39_s29, %s39_s29 }
  0x2b   :  { %p664_p5 = scmp.ne.s32.totalorder %s39_s29, %s663_s19  ;;  %p669_p7 = scmp.lt.s32.totalorder %s663_s19, %s663_s19 }
  0x2d   :  { %p670_p8 = por %p669_p7, %p668_p6 }
  0x2f   :  { %p671_p9 = pnand %p670_p8, %p664_p5 }
  0x31   :  { %674 = shalt.err (!%p671_p9)
}
  0x32   :  { %44 = dma.hbm_to_vmem [thread:$0]  %s850_s2, 1664, %s39_s29, [#allocation6], %s704_s22, %s704_s22, %s705_s23  }
  0x33   :  { %697 = dma.done.wait [#allocation3], 128  }
  0x34   :  { %698 = vsyncadd [#allocation3], 4294967168 }
  0x35   :  { %699 = dma.done.wait [#allocation6], 3712  }
  0x36   :  { %700 = vsyncadd [#allocation6], 4294963584  ;;  %v708_v0 = vmov 0.0|0.0   ;;  %vm709_vm0 = vmmov 0   ;;  %v710_v1 = vmov 0.0   ;;  %v55_v2 = vld [vmem:[#allocation5] sm:$0xff] }
  0x37   :  { %537 = vmatprep.subr.bf16.mxu0 %v708_v0  ;;  %504 = vmatprep.mubr.msk.f32.mxu0 %vm709_vm0, %v710_v1  ;;  %v56_v3 = vld [vmem:[#allocation5 + $0x8] sm:$0xff]  ;;  %v57_v4 = vld [vmem:[#allocation5 + $0x10] sm:$0xff]  ;;  %v58_v6 = vld [vmem:[#allocation5 + $0x18] sm:$0xff]  ;;  %s711_s2 = smov 64   ;;  %s712_s21 = smov 96   ;;  %vm186_vm1 = vcmask 261120  }
  0x38   :  { %561 = vmatprep.subr.bf16.mxu1 %v708_v0  ;;  %523 = vmatprep.mubr.msk.f32.mxu1 %vm709_vm0, %v710_v1  ;;  %v538_v5 = vpack.c.bf16 %v56_v3, %v55_v2  ;;  %v541_v7 = vpack.c.bf16 %v58_v6, %v57_v4  ;;  %v59_v8 = vld [vmem:[#allocation5 + $0x20] sm:$0xff]  ;;  %v60_v9 = vld [vmem:[#allocation5 + $0x28] sm:$0xff]  ;;  %v61_v11 = vld [vmem:[#allocation5 + $0x30] sm:$0xff]  ;;  %s713_s22 = smov 32   ;;  %vm192_vm2 = vcmask 523264   ;;  %s715_s23 = smov 95  }
  0x39   :  { %v544_v10 = vpack.c.bf16 %v60_v9, %v59_v8  ;;  %v62_v12 = vld [vmem:[#allocation5 + $0x38] sm:$0xff]  ;;  %v63_v14 = vld [vmem:[#allocation5 + $0x40] sm:$0xff]  ;;  %v64_v15 = vld [vmem:[#allocation5 + $0x48] sm:$0xff]  ;;  %s716_s24 = smov 98   ;;  %s717_s25 = smov 65   ;;  %vm411_vm5 = vcmask 531456  }
  0x3a   :  { %539 = vmatpush3.bf16.msra.mxu0 %v538_v5  ;;  %v547_v13 = vpack.c.bf16 %v62_v12, %v61_v11  ;;  %v550_v16 = vpack.c.bf16 %v64_v15, %v63_v14  ;;  %v65_v17 = vld [vmem:[#allocation5 + $0x50] sm:$0xff]  ;;  %v66_v18 = vld [vmem:[#allocation5 + $0x58] sm:$0xff]  ;;  %v67_v20 = vld [vmem:[#allocation5 + $0x60] sm:$0xff]  ;;  %v714_v11 = vmov 96   ;;  %vm413_vm6 = vcmask 539648   ;;  %s718_s26 = smov [#allocation8]  }
  0x3b   :  { %540 = vmatprep.subr.bf16.mxu0 %v708_v0  ;;  %v553_v19 = vpack.c.bf16 %v66_v18, %v65_v17  ;;  %v68_v21 = vld [vmem:[#allocation5 + $0x68] sm:$0xff]  ;;  %v69_v23 = vld [vmem:[#allocation5 + $0x70] sm:$0xff]  ;;  %v70_v24 = vld [vmem:[#allocation5 + $0x78] sm:$0xff]  ;;  %596 = vset.pattern.permute.xlu0 %v714_v11  ;;  %s424_s27 = sshll.u32 %s718_s26, 4  ;;  %vm415_vm7 = vcmask 547840   ;;  %s425_s27 = int_to_ptr.vmem [resolvable:$true] %s424_s27 }
  0x3c   :  { %v556_v22 = vpack.c.bf16 %v68_v21, %v67_v20  ;;  %v559_v25 = vpack.c.bf16 %v70_v24, %v69_v23  ;;  %v794_v26 = vld [vmem:[#allocation2] sm:$0xff]  ;;  %v169_v29 = vld [vmem:[#allocation7] sm:$0xff]  ;;  %v170_v30 = vld [vmem:[#allocation7 + $0x8] sm:$0xff]  ;;  %595 = vset.pattern.permute.xlu1 %v714_v11  ;;  %s675_s28 = scalar_lea.vmem %s425_s27, 128  ;;  %p680_p11 = scmp.lt.s32.totalorder %s425_s27, %s425_s27 }
  0x3d   :  { %v171_v31 = vld [vmem:[#allocation7 + $0x10] sm:$0xff]  ;;  %v562_v32 = vpack.c.bf16 %v170_v30, %v169_v29  ;;  %v172_v33 = vld [vmem:[#allocation7 + $0x18] sm:$0xff]  ;;  %v173_v35 = vld [vmem:[#allocation7 + $0x20] sm:$0xff]  ;;  %v352_v60 = vsub.f32 1.0, %v794_v26  ;;  %p676_p10 = scmp.ne.s32.totalorder %s425_s27, %s675_s28  ;;  %p681_p12 = scmp.lt.s32.totalorder %s675_s28, %s675_s28 }
  0x3e   :  { %542 = vmatpush3.bf16.msra.mxu0 %v541_v7  ;;  %v565_v34 = vpack.c.bf16 %v172_v33, %v171_v31  ;;  %v174_v36 = vld [vmem:[#allocation7 + $0x28] sm:$0xff]  ;;  %v175_v42 = vld [vmem:[#allocation7 + $0x30] sm:$0xff]  ;;  %v176_v43 = vld [vmem:[#allocation7 + $0x38] sm:$0xff] }
  0x3f   :  { %543 = vmatprep.subr.bf16.mxu0 %v708_v0  ;;  %563 = vmatpush3.bf16.msra.mxu1 %v562_v32  ;;  %v568_v38 = vpack.c.bf16 %v174_v36, %v173_v35  ;;  %v571_v44 = vpack.c.bf16 %v176_v43, %v175_v42  ;;  %v177_v50 = vld [vmem:[#allocation7 + $0x40] sm:$0xff]  ;;  %v178_v51 = vld [vmem:[#allocation7 + $0x48] sm:$0xff]  ;;  %v179_v57 = vld [vmem:[#allocation7 + $0x50] sm:$0xff]  ;;  %p682_p13 = por %p681_p12, %p680_p11 }
  0x40   :  { %564 = vmatprep.subr.bf16.mxu1 %v708_v0  ;;  %v574_v54 = vpack.c.bf16 %v178_v51, %v177_v50  ;;  %v180_v58 = vld [vmem:[#allocation7 + $0x58] sm:$0xff]  ;;  %v435_v61 = vld [vmem:[#allocation7 + $0x60] ss:$0 sm:$0xff]  ;;  %v437_v5 = vld [vmem:[#allocation7 + $0x61] ss:$0 sm:$0xff] }
  0x41   :  { %v577_v59 = vpack.c.bf16 %v180_v58, %v179_v57  ;;  %p683_p0 = pnand %p682_p13, %p676_p10 }
  0x42   :  { %545 = vmatpush3.bf16.msra.mxu0 %v544_v10 }
  0x43   :  { %546 = vmatprep.subr.bf16.mxu0 %v708_v0  ;;  %566 = vmatpush3.bf16.msra.mxu1 %v565_v34 }
  0x44   :  { %567 = vmatprep.subr.bf16.mxu1 %v708_v0 }
  0x46   :  { %548 = vmatpush3.bf16.msra.mxu0 %v547_v13 }
  0x47   :  { %549 = vmatprep.subr.bf16.mxu0 %v708_v0  ;;  %569 = vmatpush3.bf16.msra.mxu1 %v568_v38 }
  0x48   :  { %570 = vmatprep.subr.bf16.mxu1 %v708_v0 }
  0x4a   :  { %551 = vmatpush3.bf16.msra.mxu0 %v550_v16 }
  0x4b   :  { %552 = vmatprep.subr.bf16.mxu0 %v708_v0  ;;  %572 = vmatpush3.bf16.msra.mxu1 %v571_v44 }
  0x4c   :  { %573 = vmatprep.subr.bf16.mxu1 %v708_v0 }
  0x4e   :  { %554 = vmatpush3.bf16.msra.mxu0 %v553_v19 }
  0x4f   :  { %555 = vmatprep.subr.bf16.mxu0 %v708_v0 }
  0x52   :  { %557 = vmatpush3.bf16.msra.mxu0 %v556_v22 }
  0x53   :  { %558 = vmatprep.subr.bf16.mxu0 %v708_v0 }
  0x56   :  { %560 = vmatpush3.bf16.msra.mxu0 %v559_v25 }
  0x59   :  { %505 = vmatmul.mubr.f32.vlgmr.msra.gmra.mrb[0].mxu0 %v794_v26 }
 0x12c   :  { %v137_v27 = vpop.f32.mrb[0].mxu0 }
 0x12d   :  { %597 = vtanh.f32 %v137_v27  ;;  %v506_v28 = vpop.f32.mrb[1].mxu0  ;;  %v434_v39 = vmul.f32 -1.442695, %v137_v27 }
 0x12f   :  { %599 = vpow2.f32 %v434_v39 }
 0x137   :  { %v598_v37 = vpop.eup %597 }
 0x138   :  { %154 = vrot.lane.b32.xlu0 %v598_v37, %s711_s2 }
 0x139   :  { %v600_v40 = vpop.eup %599 }
 0x13a   :  { %v144_v41 = vadd.f32 1.0, %v600_v40 }
 0x13c   :  { %149 = vrot.lane.b32.xlu0 %v794_v26, %s712_s21  ;;  %601 = vrcp.f32 %v144_v41 }
 0x140   :  { %354 = vrot.lane.b32.xlu0 %v352_v60, %s713_s22 }
 0x146   :  { %v804_v45 = vpop.eup %601 }
 0x1aa   :  { %v155_v46 = vpop.permute.xlu0 %154 }
 0x1ab   :  { %v157_v47 = vmul.f32 %v804_v45, %v155_v46 }
 0x1ad   :  { %159 = vrot.lane.b32.xlu1 %v157_v47, %s713_s22 }
 0x1ae   :  { %v150_v48 = vpop.permute.xlu0 %149 }
 0x1af   :  { %v152_v52 = vmul.f32 %v804_v45, %v150_v48 }
 0x1b1   :  { %183 = vrot.lane.b32.xlu1 %v794_v26, %s711_s2 }
 0x1b2   :  { %v355_v12 = vpop.permute.xlu0 %354 }
 0x21f   :  { %v160_v49 = vpop.permute.xlu1 %159 }
 0x220   :  { %v811_v53 = vadd.f32 %v160_v49, %v152_v52 }
 0x223   :  { %v184_v55 = vpop.permute.xlu1 %183 }
 0x224   :  { %v187_v56 = vsel %vm186_vm1, %v184_v55, %v811_v53 }
 0x225   :  { %524 = vmatmul.mubr.msk.f32.vlgmr.msra.gmra.mrb[0].mxu1 %vm192_vm2, %v187_v56 }
 0x226   :  { %575 = vmatpush3.bf16.msra.mxu1 %v574_v54  ;;  %534 = vmatprep.mubr.msk.f32.mxu1 %vm709_vm0, %v710_v1 }
 0x227   :  { %576 = vmatprep.subr.bf16.mxu1 %v708_v0 }
 0x22a   :  { %578 = vmatpush3.bf16.msra.mxu1 %v577_v59 }
 0x2f8   :  { %v262_v62 = vpop.f32.mrb[0].mxu1 }
 0x2f9   :  { %v263_v63 = vadd.f32 %v435_v61, %v262_v62  ;;  %v525_v2 = vpop.f32.mrb[1].mxu1 }
 0x2fb   :  { %vm266_vm3 = vcmp.gt.f32.partialorder %v263_v63, 0.0  ;;  %v267_v3 = vmul.f32 0.01, %v263_v63 }
 0x2fd   :  { %v268_v4 = vsel %vm266_vm3, %v263_v63, %v267_v3 }
 0x2fe   :  { %535 = vmatmul.mubr.msk.f32.vlgmr.msra.gmra.mrb[2].mxu1 %vm186_vm1, %v268_v4 }
 0x3d1   :  { %v342_v6 = vpop.f32.mrb[2].mxu1 }
 0x3d2   :  { %v343_v0 = vadd.f32 %v437_v5, %v342_v6  ;;  %v536_v7 = vpop.f32.mrb[3].mxu1 }
 0x3d4   :  { %v439_v8 = vmul.f32 -1.442695, %v343_v0 }
 0x3d6   :  { %603 = vpow2.f32 %v439_v8 }
 0x3e0   :  { %v604_v9 = vpop.eup %603 }
 0x3e1   :  { %v349_v10 = vadd.f32 1.0, %v604_v9 }
 0x3e3   :  { %605 = vrcp.f32 %v349_v10 }
 0x3e4   :  { %607 = vtanh.f32 %v811_v53 }
 0x3ed   :  { %v606_v13 = vpop.eup %605 }
 0x3ee   :  { %v357_v14 = vmin.f32 %v606_v13, %v355_v12  ;;  %364 = vrot.lane.b32.xlu0 %v606_v13, %s715_s23  ;;  %v608_v20 = vpop.eup %607 }
 0x3f0   :  { %359 = vrot.lane.b32.xlu1 %v357_v14, %s712_s21 }
 0x460   :  { %v365_v17 = vpop.permute.xlu0 %364 }
 0x462   :  { %v360_v15 = vpop.permute.xlu1 %359 }
 0x463   :  { %v362_v16 = vadd.f32 %v360_v15, %v794_v26 }
 0x465   :  { %vm367_vm4 = vcmp.gt.f32.partialorder %v362_v16, %v365_v17 }
 0x466   :  { %v440_v18 = vsel %vm367_vm4, 1.0, %v710_v1 }
 0x467   :  { %372 = vperm.xlu0 %596, %v440_v18   ;;  %v376_v19 = vsub.f32 1.0, %v440_v18 }
 0x469   :  { %379 = vperm.xlu1 %595, %v376_v19   ;;  %v393_v23 = vmul.f32 %v376_v19, %v362_v16 }
 0x46d   :  { %165 = vrot.lane.b32.xlu1 %v608_v20, %s711_s2 }
 0x4e6   :  { %v373_v25 = vpop.permute.xlu0 %372 }
 0x4e7   :  { %v388_v30 = vmul.f32 %v373_v25, %v811_v53 }
 0x4e8   :  { %v380_v21 = vpop.permute.xlu1 %379 }
 0x4e9   :  { %v382_v22 = vmul.f32 %v380_v21, %v794_v26 }
 0x4eb   :  { %389 = vrot.lane.b32.xlu0 %v382_v22, %s712_s21  ;;  %384 = vrot.lane.b32.xlu1 %v382_v22, %s711_s2 }
 0x4ec   :  { %v166_v24 = vpop.permute.xlu1 %165 }
 0x4ed   :  { %v168_v1 = vmul.f32 %v804_v45, %v166_v24 }
 0x4ef   :  { %399 = vrot.lane.b32.xlu0 %v393_v23, %s712_s21  ;;  %v375_v27 = vmul.f32 %v373_v25, %v168_v1 }
 0x4f3   :  { %406 = vrot.lane.b32.xlu0 %v362_v16, %s716_s24 }
 0x55d   :  { %v385_v28 = vpop.permute.xlu1 %384  ;;  %v390_v26 = vpop.permute.xlu0 %389 }
 0x55e   :  { %v387_v29 = vadd.f32 %v385_v28, %v375_v27  ;;  %v392_v31 = vadd.f32 %v390_v26, %v388_v30 }
 0x560   :  { %395 = vrot.lane.b32.xlu1 %v387_v29, %s713_s22 }
 0x561   :  { %v400_v32 = vpop.permute.xlu0 %399 }
 0x564   :  { %402 = vrot.lane.b32.xlu1 %v606_v13, %s717_s25 }
 0x565   :  { %v407_v37 = vpop.permute.xlu0 %406 }
 0x5d2   :  { %v396_v33 = vpop.permute.xlu1 %395 }
 0x5d3   :  { %v409_v34 = vsel %vm186_vm1, %v396_v33, %v392_v31 }
 0x5d4   :  { %v410_v35 = vsel %vm192_vm2, %v409_v34, %v400_v32 }
 0x5d6   :  { %v403_v36 = vpop.permute.xlu1 %402 }
 0x5d7   :  { %v412_v38 = vsel %vm411_vm5, %v410_v35, %v403_v36 }
 0x5d8   :  { %v414_v39 = vsel %vm413_vm6, %v412_v38, %v407_v37 }
 0x5d9   :  { %v416_v40 = vsel %vm415_vm7, %v414_v39, 0.0 }
 0x5da   :  { %417 = vst [vmem:[#allocation8] sm:$0xff] %v416_v40 }
 0x5db   :  { %686 = shalt.err (!%p683_p0)
}
 0x5dc   :  { %s687_s4 = scalar_lea.hbm %s851_s3, 128 }
 0x5dd   :  { %p688_p1 = scmp.ne.s32.totalorder %s851_s3, %s687_s4  ;;  %p691_p2 = scmp.lt.u32.totalorder %s687_s4, %s851_s3 }
 0x5df   :  { %p693_p3 = pnand %p691_p2, %p688_p1 }
 0x5e1   :  { %696 = shalt.err (!%p693_p3)
}
 0x5e2   :  { %427 = dma.vmem_to_hbm [thread:$0]  %s425_s27, 128, %s851_s3, [#allocation4]  }
 0x5e3   :  { %701 = dma.done.wait [#allocation4], 128  }
 0x5e4   :  { %702 = vsyncadd [#allocation4], 4294967168 }
 0x5e5   :  { %431 = vsyncpa [#allocation3], 1 }
 0x5e6   :  { %432 = vsyncpa [#allocation6], 1 }
 0x5e7   :  { %433 = vsyncpa [#allocation4], 1 }

</bundles_post_ra>
